<compile_context>
chip_gen: v7x
topology: tpu7x:2x2x1
jax: 0.10.0
libtpu: 0.0.40
codegen_flags: <defaults>
</compile_context>

<pallas_src>
import functools

import jax
import jax.numpy as jnp
from jax.experimental import pallas as pl
from jax.experimental.pallas import tpu as pltpu


def _round_up(x: int, m: int) -> int:
    return (x + m - 1) // m * m


def fc_kernel(x_ref, w_ref, b_ref, o_ref, acc_ref):
    k = pl.program_id(2)

    @pl.when(k == 0)
    def _():
        acc_ref[...] = jnp.zeros_like(acc_ref)

    # dropout(p=0.0) in eval mode is the identity -> nothing to do.
    # TODO(synk): training-mode dropout (p>0) would need pltpu.prng_* masking.
    # tanh in f32 on the fresh x tile (EUP op, hidden under MXU work); recompute
    # across the j axis is accepted -- at these K/N tile ratios EUP is not the
    # binding slot.
    act = jnp.tanh(x_ref[...].astype(jnp.float32)).astype(w_ref.dtype)
    acc_ref[...] += jnp.dot(act, w_ref[...], preferred_element_type=jnp.float32)

    @pl.when(k == pl.num_programs(2) - 1)
    def _():
        o_ref[...] = (acc_ref[...] + b_ref[...]).astype(o_ref.dtype)


@functools.partial(jax.jit, static_argnames=("tm", "tn", "tk", "compute_dtype"))
def fc_layer(x, weight, bias, *, tm=256, tn=256, tk=256,
             compute_dtype=jnp.bfloat16):
    """x: (B, in_dim), weight: (out_dim, in_dim) (PyTorch nn.Linear layout),
    bias: (out_dim,).  Returns (B, out_dim) in x.dtype."""
    B, K = x.shape
    N, K_w = weight.shape
    assert K == K_w, (K, K_w)

    # Clip tiles to (padded) problem size; keep sublane x8 / lane x128 aligned.
    tm = min(tm, _round_up(B, 8))
    tk = min(tk, _round_up(K, 128))
    tn = min(tn, _round_up(N, 128))
    Mp, Kp, Np = _round_up(B, tm), _round_up(K, tk), _round_up(N, tn)

    # Zero-pad to tile multiples (free layout plumbing outside the kernel).
    x_p = jnp.pad(x, ((0, Mp - B), (0, Kp - K)))
    # One-time transpose so the kernel contracts on the lane axis (no in-kernel
    # .T), and cast the big weight stream to the MXU dtype to halve DMA bytes.
    w_t = jnp.pad(weight.T, ((0, Kp - K), (0, Np - N))).astype(compute_dtype)
    b_p = jnp.pad(bias, (0, Np - N)).reshape(1, Np).astype(jnp.float32)

    grid = (Mp // tm, Np // tn, Kp // tk)

    out_p = pl.pallas_call(
        fc_kernel,
        out_shape=jax.ShapeDtypeStruct((Mp, Np), x.dtype),
        grid_spec=pltpu.PrefetchScalarGridSpec(
            num_scalar_prefetch=0,
            grid=grid,
            in_specs=[
                pl.BlockSpec((tm, tk), lambda i, j, k: (i, k)),   # x tile
                pl.BlockSpec((tk, tn), lambda i, j, k: (k, j)),   # w^T tile
                pl.BlockSpec((1, tn), lambda i, j, k: (0, j)),    # bias tile
            ],
            out_specs=pl.BlockSpec((tm, tn), lambda i, j, k: (i, j)),
            scratch_shapes=[pltpu.VMEM((tm, tn), jnp.float32)],
        ),
        compiler_params=pltpu.CompilerParams(
            dimension_semantics=("parallel", "parallel", "arbitrary"),
        ),
    )(x_p, w_t, b_p)

    return out_p[:B, :N]


if __name__ == "__main__":
    key = jax.random.PRNGKey(0)
    kx, kw, kb = jax.random.split(key, 3)

    batch, input_dim, output_dim = 8, 32, 16

    x = jax.random.normal(kx, (batch, input_dim), dtype=jnp.float32)
    # Deterministic nn.Linear-style init: U(-1/sqrt(in_dim), 1/sqrt(in_dim))
    bound = 1.0 / (input_dim ** 0.5)
    weight = jax.random.uniform(kw, (output_dim, input_dim),
                                minval=-bound, maxval=bound, dtype=jnp.float32)
    bias = jax.random.uniform(kb, (output_dim,),
                              minval=-bound, maxval=bound, dtype=jnp.float32)

    # Reference in plain JAX (dropout p=0 is identity, then tanh, then linear).
    ref = jnp.tanh(x) @ weight.T + bias

    # bf16-MXU path (default): looser tolerance.
    out_bf16 = fc_layer(x, weight, bias)
    jax.block_until_ready(out_bf16)
    assert out_bf16.shape == (batch, output_dim)
    assert jnp.allclose(out_bf16, ref, atol=2e-2, rtol=2e-2), (
        float(jnp.max(jnp.abs(out_bf16 - ref))))

    # Exact f32 path: tight tolerance.
    out_f32 = fc_layer(x, weight, bias, compute_dtype=jnp.float32)
    jax.block_until_ready(out_f32)
    assert jnp.allclose(out_f32, ref, atol=1e-5, rtol=1e-5), (
        float(jnp.max(jnp.abs(out_f32 - ref))))

    print("KERNEL_OK")
</pallas_src>

<mosaic_0001>
module attributes {stable_mosaic.version = 11 : i64} {
  func.func @fc_kernel(%arg0: i32, %arg1: i32, %arg2: i32, %arg3: memref<8x128xf32, #tpu.memory_space<vmem>>, %arg4: memref<128x128xbf16, #tpu.memory_space<vmem>>, %arg5: memref<1x128xf32, #tpu.memory_space<vmem>>, %arg6: memref<8x128xf32, #tpu.memory_space<vmem>>, %arg7: memref<8x128xf32, #tpu.memory_space<vmem>>) attributes {dimension_semantics = [#tpu.dimension_semantics<parallel>, #tpu.dimension_semantics<parallel>, #tpu.dimension_semantics<arbitrary>], iteration_bounds = array<i64: 1, 1, 1>, scalar_prefetch = 0 : i64, scratch_operands = 1 : i64, tpu.core_type = #tpu.core_type<tc>, window_params = [{transform_indices = @transform_0, window_bounds = array<i64: 8, 128>}, {transform_indices = @transform_1, window_bounds = array<i64: 128, 128>}, {transform_indices = @transform_2, window_bounds = array<i64: 1, 128>}, {transform_indices = @transform_3, window_bounds = array<i64: 8, 128>}]} {
    %c0_i32 = arith.constant 0 : i32
    %0 = arith.cmpi eq, %arg2, %c0_i32 : i32
    %1 = arith.extui %0 : i1 to i32
    %c0_i32_0 = arith.constant 0 : i32
    %2 = arith.cmpi ne, %1, %c0_i32_0 : i32
    scf.if %2 {
      %cst_10 = arith.constant 0.000000e+00 : f32
      %14 = vector.broadcast %cst_10 : f32 to vector<8x128xf32>
      %c0_11 = arith.constant 0 : index
      %c0_12 = arith.constant 0 : index
      %15 = vector.load %arg7[%c0_11, %c0_12] : memref<8x128xf32, #tpu.memory_space<vmem>>, vector<8x128xf32>
      tpu.vector_store %arg7[%c0_11, %c0_12], %14 {strides = array<i32>} : memref<8x128xf32, #tpu.memory_space<vmem>>, vector<8x128xf32>,
    } else {
    }
    %c0 = arith.constant 0 : index
    %c0_1 = arith.constant 0 : index
    %3 = vector.load %arg3[%c0, %c0_1] : memref<8x128xf32, #tpu.memory_space<vmem>>, vector<8x128xf32>
    %4 = math.tanh %3 : vector<8x128xf32>
    %5 = arith.truncf %4 : vector<8x128xf32> to vector<8x128xbf16>
    %c0_2 = arith.constant 0 : index
    %c0_3 = arith.constant 0 : index
    %6 = vector.load %arg7[%c0_2, %c0_3] : memref<8x128xf32, #tpu.memory_space<vmem>>, vector<8x128xf32>
    %c0_4 = arith.constant 0 : index
    %c0_5 = arith.constant 0 : index
    %7 = vector.load %arg4[%c0_4, %c0_5] : memref<128x128xbf16, #tpu.memory_space<vmem>>, vector<128x128xbf16>
    %cst = arith.constant dense<0.000000e+00> : vector<8x128xf32>
    %8 = tpu.matmul %5, %7, %cst {dimension_numbers = #tpu.dot_dimension_numbers<[1], [0], [0], [1], [0, 0, 1, 1], [], []>} : vector<8x128xbf16>, vector<128x128xbf16>, vector<8x128xf32> -> vector<8x128xf32>
    %9 = arith.addf %6, %8 : vector<8x128xf32>
    %c0_6 = arith.constant 0 : index
    %c0_7 = arith.constant 0 : index
    %10 = vector.load %arg7[%c0_6, %c0_7] : memref<8x128xf32, #tpu.memory_space<vmem>>, vector<8x128xf32>
    tpu.vector_store %arg7[%c0_6, %c0_7], %9 {strides = array<i32>} : memref<8x128xf32, #tpu.memory_space<vmem>>, vector<8x128xf32>,
    %c0_i32_8 = arith.constant 0 : i32
    %11 = arith.cmpi eq, %arg2, %c0_i32_8 : i32
    %12 = arith.extui %11 : i1 to i32
    %c0_i32_9 = arith.constant 0 : i32
    %13 = arith.cmpi ne, %12, %c0_i32_9 : i32
    scf.if %13 {
      %c0_10 = arith.constant 0 : index
      %c0_11 = arith.constant 0 : index
      %14 = vector.load %arg7[%c0_10, %c0_11] : memref<8x128xf32, #tpu.memory_space<vmem>>, vector<8x128xf32>
      %c0_12 = arith.constant 0 : index
      %c0_13 = arith.constant 0 : index
      %15 = vector.load %arg5[%c0_12, %c0_13] : memref<1x128xf32, #tpu.memory_space<vmem>>, vector<1x128xf32>
      %16 = vector.broadcast %15 : vector<1x128xf32> to vector<8x128xf32>
      %17 = arith.addf %14, %16 : vector<8x128xf32>
      %c0_14 = arith.constant 0 : index
      %c0_15 = arith.constant 0 : index
      %18 = vector.load %arg6[%c0_14, %c0_15] : memref<8x128xf32, #tpu.memory_space<vmem>>, vector<8x128xf32>
      tpu.vector_store %arg6[%c0_14, %c0_15], %17 {strides = array<i32>} : memref<8x128xf32, #tpu.memory_space<vmem>>, vector<8x128xf32>,
    } else {
    }
    return
  }
  func.func @transform_0(%arg0: i32, %arg1: i32, %arg2: i32) -> (i32, i32) {
    %c0_i32 = arith.constant 0 : i32
    return %arg0, %arg2 : i32, i32
  }
  func.func @transform_1(%arg0: i32, %arg1: i32, %arg2: i32) -> (i32, i32) {
    %c0_i32 = arith.constant 0 : i32
    return %arg2, %arg1 : i32, i32
  }
  func.func @transform_2(%arg0: i32, %arg1: i32, %arg2: i32) -> (i32, i32) {
    %c0_i32 = arith.constant 0 : i32
    %c0_i32_0 = arith.constant 0 : i32
    return %c0_i32, %arg1 : i32, i32
  }
  func.func @transform_3(%arg0: i32, %arg1: i32, %arg2: i32) -> (i32, i32) {
    %c0_i32 = arith.constant 0 : i32
    return %arg0, %arg1 : i32, i32
  }
}

</mosaic_0001>

<bundles_post_ra>
// kernel: fc_layer.1
= control target key start
LH: loop header
LB: loop body
LE: loop exit
PB: predicated region body
PF: predicated region fallthrough
CT: control target
= control target key end

     0   :  { %v233_v1 = vmov 0.0   ;;  %vm234_vm0 = vmmov 0   ;;  %s298_s0 = inlined_call_operand.vmem [shape: f32[8,128], index: 0, kind: input, shape index: {}]   ;;  %s299_s1 = inlined_call_operand.vmem [shape: bf16[128,128], index: 1, kind: input, shape index: {}]   ;;  %s300_s2 = inlined_call_operand.vmem [shape: f32[1,128], index: 2, kind: input, shape index: {}]   ;;  %s301_s3 = inlined_call_operand.hbm [shape: f32[8,128], index: 3, kind: output, shape index: {}]  }
   0x1   :  { %v199_v0 = vld [vmem:[%s299_s1] sm:$0xff]   ;;  %176 = vmatprep.subr.bf16.mxu0 %v233_v1  ;;  %v200_v2 = vld [vmem:[%s299_s1 + $0x8] sm:$0xff]   ;;  %192 = vmatprep.mubr.msk.bf16.mxu0 %vm234_vm0, %v233_v1  ;;  %v201_v3 = vld [vmem:[%s299_s1 + $0x10] sm:$0xff]  }
   0x2   :  { %177 = vmatpush3.bf16.msra.mxu0 %v199_v0 }
   0x3   :  { %178 = vmatprep.subr.bf16.mxu0 %v233_v1 }
   0x6   :  { %179 = vmatpush3.bf16.msra.mxu0 %v200_v2 }
   0x7   :  { %180 = vmatprep.subr.bf16.mxu0 %v233_v1 }
   0x8   :  { %8 = vsyncpa [#allocation4], 0  ;;  %v202_v4 = vld [vmem:[%s299_s1 + $0x18] sm:$0xff]   ;;  %v21_v5 = vld [vmem:[%s298_s0] sm:$0xff]  ;;  %s235_s4 = smov [#allocation3]  }
   0x9   :  { %v203_v6 = vld [vmem:[%s299_s1 + $0x20] sm:$0xff]   ;;  %207 = vtanh.f32 %v21_v5  ;;  %v204_v7 = vld [vmem:[%s299_s1 + $0x28] sm:$0xff]   ;;  %v205_v8 = vld [vmem:[%s299_s1 + $0x30] sm:$0xff]   ;;  %s150_s5 = sshll.u32 %s235_s4, 4  ;;  %s151_s5 = int_to_ptr.vmem [resolvable:$true] %s150_s5 }
   0xa   :  { %181 = vmatpush3.bf16.msra.mxu0 %v201_v3  ;;  %v206_v10 = vld [vmem:[%s299_s1 + $0x38] sm:$0xff]   ;;  %v166_v12 = vld [vmem:[%s300_s2] ss:$0 sm:$0xff]  ;;  %s209_s6 = scalar_lea.vmem %s151_s5, 128  ;;  %p214_p1 = scmp.lt.s32.totalorder %s151_s5, %s151_s5 }
   0xb   :  { %182 = vmatprep.subr.bf16.mxu0 %v233_v1  ;;  %p210_p0 = scmp.ne.s32.totalorder %s151_s5, %s209_s6  ;;  %p215_p2 = scmp.lt.s32.totalorder %s209_s6, %s209_s6 }
   0xd   :  { %p216_p3 = por %p215_p2, %p214_p1 }
   0xe   :  { %183 = vmatpush3.bf16.msra.mxu0 %v202_v4 }
   0xf   :  { %184 = vmatprep.subr.bf16.mxu0 %v233_v1  ;;  %p217_p4 = pnand %p216_p3, %p210_p0 }
  0x12   :  { %185 = vmatpush3.bf16.msra.mxu0 %v203_v6 }
  0x13   :  { %186 = vmatprep.subr.bf16.mxu0 %v233_v1  ;;  %v208_v9 = vpop.eup %207 }
  0x14   :  { %v23_v11 = vpack.c.bf16 %v208_v9, %v208_v9 }
  0x16   :  { %187 = vmatpush3.bf16.msra.mxu0 %v204_v7 }
  0x17   :  { %188 = vmatprep.subr.bf16.mxu0 %v233_v1 }
  0x1a   :  { %189 = vmatpush3.bf16.msra.mxu0 %v205_v8 }
  0x1b   :  { %190 = vmatprep.subr.bf16.mxu0 %v233_v1 }
  0x1e   :  { %191 = vmatpush3.bf16.msra.mxu0 %v206_v10 }
  0x21   :  { %193 = vmatmul.mubr.bf16.vlgmr.msra.gmra.mrb[0].mxu0 %v23_v11 }
  0xf4   :  { %v123_v13 = vpop.f32.mrb[0].mxu0 }
  0xf5   :  { %v142_v14 = vadd.f32 %v166_v12, %v123_v13  ;;  %v194_v15 = vpop.f32.mrb[1].mxu0 }
  0xf6   :  { %v126_v16 = vpop.f32.mrb[2].mxu0 }
  0xf7   :  { %143 = vst [vmem:[#allocation3] sm:$0xff] %v142_v14  ;;  %v195_v17 = vpop.f32.mrb[3].mxu0 }
  0xf8   :  { %220 = shalt.err (!%p217_p4)
}
  0xf9   :  { %s221_s2 = scalar_lea.hbm %s301_s3, 128 }
  0xfa   :  { %p222_p5 = scmp.ne.s32.totalorder %s301_s3, %s221_s2  ;;  %p225_p6 = scmp.lt.u32.totalorder %s221_s2, %s301_s3 }
  0xfc   :  { %p227_p7 = pnand %p225_p6, %p222_p5 }
  0xfe   :  { %230 = shalt.err (!%p227_p7)
}
  0xff   :  { %153 = dma.vmem_to_hbm [thread:$0]  %s151_s5, 128, %s301_s3, [#allocation4]  }
 0x100   :  { %231 = dma.done.wait [#allocation4], 128  }
 0x101   :  { %232 = vsyncadd [#allocation4], 4294967168 }
 0x102   :  { %157 = vsyncpa [#allocation4], 1 }

</bundles_post_ra>
